<compile_context>
chip_gen: v5e
topology: v5e:2x2
jax: 0.10.0
libtpu: 0.0.40
codegen_flags: <defaults>
</compile_context>

<pallas_src>
import functools

import jax
import jax.numpy as jnp
import numpy as np
from jax.experimental import pallas as pl
from jax.experimental.pallas import tpu as pltpu


def _round_up(v, m):
    return (v + m - 1) // m * m


def _nbytes(t):
    return int(t.size) * t.dtype.itemsize


# ----------------------------------------------------------------------------
# Fused two-layer kernel.  Grid = (phase, row_block).
#   phase 0: zn1[rows] = X_blk @ Wn1
#   phase 1: h_blk = relu(A_blk @ zn1 + X_blk @ Ws1 + b1)
#            h[rows] = h_blk ;  zn2[rows] = h_blk @ Wn2   (hoisted projection)
#   phase 2: out_blk = A_blk @ zn2 + h_blk @ Ws2 + b2
# zn1 / h / zn2 are VMEM-resident bf16 scratches; everything else is streamed
# row-block-wise by BlockSpec.
# ----------------------------------------------------------------------------
def gspa_fused_kernel(a_ref, x_ref, wn1_ref, ws1_ref, b1_ref,
                      wn2_ref, ws2_ref, b2_ref,
                      o_ref, zn1_ref, h_ref, zn2_ref, *, tm):
    phase = pl.program_id(0)
    blk = pl.program_id(1)
    row = pl.multiple_of(blk * tm, tm)

    @pl.when(phase == 0)
    def _():
        # Layer-1 neighbor projection, row-tiled straight into the scratch
        # (no whole-graph intermediate, no blk==0 serial bubble).
        zn1_ref[pl.ds(row, tm), :] = jnp.dot(
            x_ref[...], wn1_ref[...],
            preferred_element_type=jnp.float32).astype(zn1_ref.dtype)

    @pl.when(phase == 1)
    def _():
        # Layer-1 aggregation over the whole graph for this row block.
        agg = jnp.dot(a_ref[...], zn1_ref[...],
                      preferred_element_type=jnp.float32)
        # Self projection recomputed per block (no resident f32 zs scratch).
        zs = jnp.dot(x_ref[...], ws1_ref[...],
                     preferred_element_type=jnp.float32)
        h_blk = jnp.maximum(agg + zs + b1_ref[...], 0.0)
        h_ref[pl.ds(row, tm), :] = h_blk.astype(h_ref.dtype)
        # Layer-2 neighbor projection hoisted here (hides under A streaming).
        zn2_ref[pl.ds(row, tm), :] = jnp.dot(
            h_blk.astype(wn2_ref.dtype), wn2_ref[...],
            preferred_element_type=jnp.float32).astype(zn2_ref.dtype)

    @pl.when(phase == 2)
    def _():
        agg = jnp.dot(a_ref[...], zn2_ref[...],
                      preferred_element_type=jnp.float32)
        zs = jnp.dot(h_ref[pl.ds(row, tm), :], ws2_ref[...],
                     preferred_element_type=jnp.float32)
        o_ref[...] = (agg + zs + b2_ref[...]).astype(o_ref.dtype)


# ----------------------------------------------------------------------------
# Wrapper: pad to lane/sublane-dense shapes, choose the row tile, build grid.
# ----------------------------------------------------------------------------
def gspa_forward(a_norm, x, params, *, tm=None):
    n, f = x.shape
    h_dim = params["w_neigh1"].shape[1]
    c_dim = params["w_neigh2"].shape[1]

    lane = 128
    f_pad = _round_up(f, lane)
    d1_pad = _round_up(h_dim, lane)         # per-layer padding (no shared max)
    d2_pad = _round_up(c_dim, lane)

    # Row tile: full MXU M dim, multiple of 16 (bf16 sublane packing).
    # TODO(synk): for very large N, size tm from measured VMEM headroom.
    if tm is None:
        tm = 256 if n >= 256 else 128
    tm = _round_up(max(tm, 16), 16)
    n_pad = _round_up(max(n, tm), lane)     # lane-dense A blocks / full MXU K
    n_pad = _round_up(n_pad, tm)            # divisible by the row tile
    nb = n_pad // tm

    bf16, f32 = jnp.bfloat16, jnp.float32

    def pad2(a, r, c, dtype):
        a = jnp.asarray(a, f32)
        return jnp.zeros((r, c), f32).at[:a.shape[0], :a.shape[1]].set(a).astype(dtype)

    a_p = pad2(a_norm, n_pad, n_pad, bf16)
    x_p = pad2(x, n_pad, f_pad, bf16)
    wn1 = pad2(params["w_neigh1"], f_pad, d1_pad, bf16)
    ws1 = pad2(params["w_self1"], f_pad, d1_pad, bf16)
    b1 = pad2(params["b1"], 1, d1_pad, f32)
    wn2 = pad2(params["w_neigh2"], d1_pad, d2_pad, bf16)
    ws2 = pad2(params["w_self2"], d1_pad, d2_pad, bf16)
    b2 = pad2(params["b2"], 1, d2_pad, f32)

    # VMEM residency: resident scratches + double-buffered streamed blocks +
    # weight buffers.  Clamp the scoped limit to 64 MiB (v7x physical VMEM).
    resident = (n_pad * d1_pad * 2 * 2                    # zn1 + h (bf16)
                + n_pad * d2_pad * 2                      # zn2 (bf16)
                + 2 * tm * n_pad * 2                      # A row block x2
                + 2 * tm * f_pad * 2                      # X row block x2
                + 2 * tm * d2_pad * 4                     # out block x2
                + 2 * (_nbytes(wn1) + _nbytes(ws1) + _nbytes(wn2)
                       + _nbytes(ws2) + _nbytes(b1) + _nbytes(b2)))
    vmem_limit = int(min(max(32 << 20, resident * 3 // 2 + (2 << 20)), 64 << 20))

    flops = (2 * n_pad * f_pad * d1_pad          # zn1
             + 2 * n_pad * n_pad * d1_pad        # layer-1 aggregation
             + 2 * n_pad * f_pad * d1_pad        # zs1 (recomputed)
             + 2 * n_pad * d1_pad * d2_pad       # zn2
             + 2 * n_pad * n_pad * d2_pad        # layer-2 aggregation
             + 2 * n_pad * d1_pad * d2_pad)      # zs2 (recomputed)
    bytes_accessed = (2 * _nbytes(a_p) + 2 * _nbytes(x_p)
                      + _nbytes(wn1) + _nbytes(ws1) + _nbytes(wn2)
                      + _nbytes(ws2) + _nbytes(b1) + _nbytes(b2)
                      + n_pad * d2_pad * 4)

    kernel = functools.partial(gspa_fused_kernel, tm=tm)
    out = pl.pallas_call(
        kernel,
        out_shape=jax.ShapeDtypeStruct((n_pad, d2_pad), f32),
        grid_spec=pltpu.PrefetchScalarGridSpec(
            num_scalar_prefetch=0,
            grid=(3, nb),                                   # (phase, row block)
            in_specs=[
                # A row block: only streamed in phases 1 & 2 (block 0 in phase 0).
                pl.BlockSpec((tm, n_pad),
                             lambda p, i: (jnp.where(p == 0, 0, i), 0)),
                # X row block: only streamed in phases 0 & 1 (block 0 in phase 2).
                pl.BlockSpec((tm, f_pad),
                             lambda p, i: (jnp.where(p == 2, 0, i), 0)),
                pl.BlockSpec((f_pad, d1_pad), lambda p, i: (0, 0)),   # Wn1
                pl.BlockSpec((f_pad, d1_pad), lambda p, i: (0, 0)),   # Ws1
                pl.BlockSpec((1, d1_pad), lambda p, i: (0, 0)),       # b1
                pl.BlockSpec((d1_pad, d2_pad), lambda p, i: (0, 0)),  # Wn2
                pl.BlockSpec((d1_pad, d2_pad), lambda p, i: (0, 0)),  # Ws2
                pl.BlockSpec((1, d2_pad), lambda p, i: (0, 0)),       # b2
            ],
            # Output blocks only advance (and flush) during phase 2; no zero /
            # garbage tiles are ever written back in phases 0-1.
            out_specs=pl.BlockSpec((tm, d2_pad),
                                   lambda p, i: (jnp.where(p == 2, i, 0), 0)),
            scratch_shapes=[
                pltpu.VMEM((n_pad, d1_pad), bf16),    # zn1 = X @ Wn1
                pltpu.VMEM((n_pad, d1_pad), bf16),    # h   = layer-1 activations
                pltpu.VMEM((n_pad, d2_pad), bf16),    # zn2 = h @ Wn2
            ],
        ),
        compiler_params=pltpu.CompilerParams(
            # Both axes sequential: every phase-(k+1) row block depends on ALL
            # phase-k row blocks through the per-core VMEM scratches.
            dimension_semantics=("arbitrary", "arbitrary"),
            vmem_limit_bytes=vmem_limit),
        cost_estimate=pl.CostEstimate(flops=int(flops), transcendentals=0,
                                      bytes_accessed=int(bytes_accessed)),
    )(a_p, x_p, wn1, ws1, b1, wn2, ws2, b2)

    return out[:n, :c_dim]


# ----------------------------------------------------------------------------
# Pure-JAX reference. mxu_dtype=bf16 mirrors the kernel's dtype strategy
# (bf16 MXU operands, f32 accumulation / epilogue); f32 is the exact reference.
# ----------------------------------------------------------------------------
def gspa_reference(a_norm, x, params, mxu_dtype=jnp.float32):
    f32 = jnp.float32
    cast = lambda t: jnp.asarray(t, f32).astype(mxu_dtype)

    def layer(feat, wn, ws, b, relu):
        zn = jnp.dot(cast(feat), cast(wn), preferred_element_type=f32)
        zs = jnp.dot(cast(feat), cast(ws), preferred_element_type=f32)
        y = jnp.dot(cast(a_norm), cast(zn), preferred_element_type=f32) + zs + b
        return jnp.maximum(y, 0.0) if relu else y

    h = layer(x, params["w_neigh1"], params["w_self1"], params["b1"], True)
    return layer(h, params["w_neigh2"], params["w_self2"], params["b2"], False)


# ----------------------------------------------------------------------------
# Deterministic setup: graph, features, parameters.
# ----------------------------------------------------------------------------
def build_adjacency(num_nodes, key):
    """Dense row-normalized adjacency (mean over in-neighbors)."""
    src = list(range(num_nodes))
    dst = [(i + 1) % num_nodes for i in range(num_nodes)]
    extra = jax.random.randint(key, (2, num_nodes), 0, num_nodes)
    src += list(np.array(extra[0]))
    dst += list(np.array(extra[1]))
    adj = np.zeros((num_nodes, num_nodes), dtype=np.float32)
    for u, v in zip(src, dst):
        adj[v, u] = 1.0                      # edge u -> v aggregates u into v
    in_deg = adj.sum(axis=1, keepdims=True)
    a_norm = np.where(in_deg > 0, adj / np.maximum(in_deg, 1.0), 0.0)
    return jnp.asarray(a_norm, dtype=jnp.float32)


def init_params(key, num_feature, hidden_dim, num_class):
    ks = jax.random.split(key, 6)

    def xavier(k, fan_in, fan_out):
        bound = float(np.sqrt(6.0 / (fan_in + fan_out)))
        return jax.random.uniform(k, (fan_in, fan_out), jnp.float32, -bound, bound)

    return {
        "w_neigh1": xavier(ks[0], num_feature, hidden_dim),
        "w_self1":  xavier(ks[1], num_feature, hidden_dim),
        "b1":       jnp.zeros((1, hidden_dim), jnp.float32),
        "w_neigh2": xavier(ks[2], hidden_dim, num_class),
        "w_self2":  xavier(ks[3], hidden_dim, num_class),
        "b2":       jnp.zeros((1, num_class), jnp.float32),
    }


if __name__ == "__main__":
    NUM_NODES = 16
    NUM_FEATURE = 32
    HIDDEN_DIM = 32
    NUM_CLASS = 8

    key = jax.random.PRNGKey(0)
    k_adj, k_x, k_p = jax.random.split(key, 3)

    a_norm = build_adjacency(NUM_NODES, k_adj)
    x = jax.random.normal(k_x, (NUM_NODES, NUM_FEATURE), jnp.float32)
    params = init_params(k_p, NUM_FEATURE, HIDDEN_DIM, NUM_CLASS)

    out = gspa_forward(a_norm, x, params)
    out = jax.block_until_ready(out)
    assert out.shape == (NUM_NODES, NUM_CLASS)

    # Tight check against a reference that mirrors the kernel's bf16-input /
    # f32-accumulate strategy; loose sanity check against the pure-f32 math.
    ref_bf16 = gspa_reference(a_norm, x, params, mxu_dtype=jnp.bfloat16)
    ref_f32 = gspa_reference(a_norm, x, params, mxu_dtype=jnp.float32)
    np.testing.assert_allclose(np.array(out), np.array(ref_bf16),
                               rtol=1e-2, atol=1e-2)
    np.testing.assert_allclose(np.array(out), np.array(ref_f32),
                               rtol=1e-1, atol=1e-1)

    print("KERNEL_OK")
</pallas_src>

<mosaic_0001>
module attributes {stable_mosaic.version = 11 : i64} {
  func.func @gspa_fused_kernel(%arg0: i32, %arg1: i32, %arg2: memref<128x128xbf16, #tpu.memory_space<vmem>>, %arg3: memref<128x128xbf16, #tpu.memory_space<vmem>>, %arg4: memref<128x128xbf16, #tpu.memory_space<vmem>>, %arg5: memref<128x128xbf16, #tpu.memory_space<vmem>>, %arg6: memref<1x128xf32, #tpu.memory_space<vmem>>, %arg7: memref<128x128xbf16, #tpu.memory_space<vmem>>, %arg8: memref<128x128xbf16, #tpu.memory_space<vmem>>, %arg9: memref<1x128xf32, #tpu.memory_space<vmem>>, %arg10: memref<128x128xf32, #tpu.memory_space<vmem>>, %arg11: memref<128x128xbf16, #tpu.memory_space<vmem>>, %arg12: memref<128x128xbf16, #tpu.memory_space<vmem>>, %arg13: memref<128x128xbf16, #tpu.memory_space<vmem>>) attributes {dimension_semantics = [#tpu.dimension_semantics<arbitrary>, #tpu.dimension_semantics<arbitrary>], iteration_bounds = array<i64: 3, 1>, scalar_prefetch = 0 : i64, scratch_operands = 3 : i64, tpu.core_type = #tpu.core_type<tc>, window_params = [{transform_indices = @transform_0, window_bounds = array<i64: 128, 128>}, {transform_indices = @transform_1, window_bounds = array<i64: 128, 128>}, {pipeline_mode = #tpu.pipeline_mode<synchronous>, transform_indices = @transform_2, window_bounds = array<i64: 128, 128>}, {pipeline_mode = #tpu.pipeline_mode<synchronous>, transform_indices = @transform_3, window_bounds = array<i64: 128, 128>}, {pipeline_mode = #tpu.pipeline_mode<synchronous>, transform_indices = @transform_4, window_bounds = array<i64: 1, 128>}, {pipeline_mode = #tpu.pipeline_mode<synchronous>, transform_indices = @transform_5, window_bounds = array<i64: 128, 128>}, {pipeline_mode = #tpu.pipeline_mode<synchronous>, transform_indices = @transform_6, window_bounds = array<i64: 128, 128>}, {pipeline_mode = #tpu.pipeline_mode<synchronous>, transform_indices = @transform_7, window_bounds = array<i64: 1, 128>}, {transform_indices = @transform_8, window_bounds = array<i64: 128, 128>}]} {
    %c128_i32 = arith.constant 128 : i32
    %0 = arith.muli %arg1, %c128_i32 : i32
    %1 = tpu.assume_multiple %0, 128 : i32
    %c0_i32 = arith.constant 0 : i32
    %2 = arith.cmpi eq, %arg0, %c0_i32 : i32
    %3 = arith.extui %2 : i1 to i32
    %c0_i32_0 = arith.constant 0 : i32
    %4 = arith.cmpi ne, %3, %c0_i32_0 : i32
    scf.if %4 {
      %c0 = arith.constant 0 : index
      %c0_3 = arith.constant 0 : index
      %11 = vector.load %arg3[%c0, %c0_3] : memref<128x128xbf16, #tpu.memory_space<vmem>>, vector<128x128xbf16>
      %c0_4 = arith.constant 0 : index
      %c0_5 = arith.constant 0 : index
      %12 = vector.load %arg4[%c0_4, %c0_5] : memref<128x128xbf16, #tpu.memory_space<vmem>>, vector<128x128xbf16>
      %cst = arith.constant dense<0.000000e+00> : vector<128x128xf32>
      %13 = tpu.matmul %11, %12, %cst {dimension_numbers = #tpu.dot_dimension_numbers<[1], [0], [0], [1], [0, 0, 1, 1], [], []>} : vector<128x128xbf16>, vector<128x128xbf16>, vector<128x128xf32> -> vector<128x128xf32>
      %14 = arith.truncf %13 : vector<128x128xf32> to vector<128x128xbf16>
      %15 = arith.index_cast %1 : i32 to index
      %c0_6 = arith.constant 0 : index
      %16 = vector.load %arg11[%15, %c0_6] : memref<128x128xbf16, #tpu.memory_space<vmem>>, vector<128x128xbf16>
      tpu.vector_store %arg11[%15, %c0_6], %14 {strides = array<i32>} : memref<128x128xbf16, #tpu.memory_space<vmem>>, vector<128x128xbf16>,
    } else {
    }
    %c1_i32 = arith.constant 1 : i32
    %5 = arith.cmpi eq, %arg0, %c1_i32 : i32
    %6 = arith.extui %5 : i1 to i32
    %c0_i32_1 = arith.constant 0 : i32
    %7 = arith.cmpi ne, %6, %c0_i32_1 : i32
    scf.if %7 {
      %c0 = arith.constant 0 : index
      %c0_3 = arith.constant 0 : index
      %11 = vector.load %arg2[%c0, %c0_3] : memref<128x128xbf16, #tpu.memory_space<vmem>>, vector<128x128xbf16>
      %c0_4 = arith.constant 0 : index
      %c0_5 = arith.constant 0 : index
      %12 = vector.load %arg11[%c0_4, %c0_5] : memref<128x128xbf16, #tpu.memory_space<vmem>>, vector<128x128xbf16>
      %cst = arith.constant dense<0.000000e+00> : vector<128x128xf32>
      %13 = tpu.matmul %11, %12, %cst {dimension_numbers = #tpu.dot_dimension_numbers<[1], [0], [0], [1], [0, 0, 1, 1], [], []>} : vector<128x128xbf16>, vector<128x128xbf16>, vector<128x128xf32> -> vector<128x128xf32>
      %c0_6 = arith.constant 0 : index
      %c0_7 = arith.constant 0 : index
      %14 = vector.load %arg3[%c0_6, %c0_7] : memref<128x128xbf16, #tpu.memory_space<vmem>>, vector<128x128xbf16>
      %c0_8 = arith.constant 0 : index
      %c0_9 = arith.constant 0 : index
      %15 = vector.load %arg5[%c0_8, %c0_9] : memref<128x128xbf16, #tpu.memory_space<vmem>>, vector<128x128xbf16>
      %cst_10 = arith.constant dense<0.000000e+00> : vector<128x128xf32>
      %16 = tpu.matmul %14, %15, %cst_10 {dimension_numbers = #tpu.dot_dimension_numbers<[1], [0], [0], [1], [0, 0, 1, 1], [], []>} : vector<128x128xbf16>, vector<128x128xbf16>, vector<128x128xf32> -> vector<128x128xf32>
      %17 = arith.addf %13, %16 : vector<128x128xf32>
      %c0_11 = arith.constant 0 : index
      %c0_12 = arith.constant 0 : index
      %18 = vector.load %arg6[%c0_11, %c0_12] : memref<1x128xf32, #tpu.memory_space<vmem>>, vector<1x128xf32>
      %19 = vector.broadcast %18 : vector<1x128xf32> to vector<128x128xf32>
      %20 = arith.addf %17, %19 : vector<128x128xf32>
      %cst_13 = arith.constant 0.000000e+00 : f32
      %21 = vector.broadcast %cst_13 : f32 to vector<128x128xf32>
      %22 = arith.maximumf %20, %21 : vector<128x128xf32>
      %23 = arith.truncf %22 : vector<128x128xf32> to vector<128x128xbf16>
      %24 = arith.index_cast %1 : i32 to index
      %c0_14 = arith.constant 0 : index
      %25 = vector.load %arg12[%24, %c0_14] : memref<128x128xbf16, #tpu.memory_space<vmem>>, vector<128x128xbf16>
      tpu.vector_store %arg12[%24, %c0_14], %23 {strides = array<i32>} : memref<128x128xbf16, #tpu.memory_space<vmem>>, vector<128x128xbf16>,
      %26 = arith.truncf %22 : vector<128x128xf32> to vector<128x128xbf16>
      %c0_15 = arith.constant 0 : index
      %c0_16 = arith.constant 0 : index
      %27 = vector.load %arg7[%c0_15, %c0_16] : memref<128x128xbf16, #tpu.memory_space<vmem>>, vector<128x128xbf16>
      %cst_17 = arith.constant dense<0.000000e+00> : vector<128x128xf32>
      %28 = tpu.matmul %26, %27, %cst_17 {dimension_numbers = #tpu.dot_dimension_numbers<[1], [0], [0], [1], [0, 0, 1, 1], [], []>} : vector<128x128xbf16>, vector<128x128xbf16>, vector<128x128xf32> -> vector<128x128xf32>
      %29 = arith.truncf %28 : vector<128x128xf32> to vector<128x128xbf16>
      %30 = arith.index_cast %1 : i32 to index
      %c0_18 = arith.constant 0 : index
      %31 = vector.load %arg13[%30, %c0_18] : memref<128x128xbf16, #tpu.memory_space<vmem>>, vector<128x128xbf16>
      tpu.vector_store %arg13[%30, %c0_18], %29 {strides = array<i32>} : memref<128x128xbf16, #tpu.memory_space<vmem>>, vector<128x128xbf16>,
    } else {
    }
    %c2_i32 = arith.constant 2 : i32
    %8 = arith.cmpi eq, %arg0, %c2_i32 : i32
    %9 = arith.extui %8 : i1 to i32
    %c0_i32_2 = arith.constant 0 : i32
    %10 = arith.cmpi ne, %9, %c0_i32_2 : i32
    scf.if %10 {
      %c0 = arith.constant 0 : index
      %c0_3 = arith.constant 0 : index
      %11 = vector.load %arg2[%c0, %c0_3] : memref<128x128xbf16, #tpu.memory_space<vmem>>, vector<128x128xbf16>
      %c0_4 = arith.constant 0 : index
      %c0_5 = arith.constant 0 : index
      %12 = vector.load %arg13[%c0_4, %c0_5] : memref<128x128xbf16, #tpu.memory_space<vmem>>, vector<128x128xbf16>
      %cst = arith.constant dense<0.000000e+00> : vector<128x128xf32>
      %13 = tpu.matmul %11, %12, %cst {dimension_numbers = #tpu.dot_dimension_numbers<[1], [0], [0], [1], [0, 0, 1, 1], [], []>} : vector<128x128xbf16>, vector<128x128xbf16>, vector<128x128xf32> -> vector<128x128xf32>
      %14 = arith.index_cast %1 : i32 to index
      %c0_6 = arith.constant 0 : index
      %15 = vector.load %arg12[%14, %c0_6] : memref<128x128xbf16, #tpu.memory_space<vmem>>, vector<128x128xbf16>
      %c0_7 = arith.constant 0 : index
      %c0_8 = arith.constant 0 : index
      %16 = vector.load %arg8[%c0_7, %c0_8] : memref<128x128xbf16, #tpu.memory_space<vmem>>, vector<128x128xbf16>
      %cst_9 = arith.constant dense<0.000000e+00> : vector<128x128xf32>
      %17 = tpu.matmul %15, %16, %cst_9 {dimension_numbers = #tpu.dot_dimension_numbers<[1], [0], [0], [1], [0, 0, 1, 1], [], []>} : vector<128x128xbf16>, vector<128x128xbf16>, vector<128x128xf32> -> vector<128x128xf32>
      %18 = arith.addf %13, %17 : vector<128x128xf32>
      %c0_10 = arith.constant 0 : index
      %c0_11 = arith.constant 0 : index
      %19 = vector.load %arg9[%c0_10, %c0_11] : memref<1x128xf32, #tpu.memory_space<vmem>>, vector<1x128xf32>
      %20 = vector.broadcast %19 : vector<1x128xf32> to vector<128x128xf32>
      %21 = arith.addf %18, %20 : vector<128x128xf32>
      %c0_12 = arith.constant 0 : index
      %c0_13 = arith.constant 0 : index
      %22 = vector.load %arg10[%c0_12, %c0_13] : memref<128x128xf32, #tpu.memory_space<vmem>>, vector<128x128xf32>
      tpu.vector_store %arg10[%c0_12, %c0_13], %21 {strides = array<i32>} : memref<128x128xf32, #tpu.memory_space<vmem>>, vector<128x128xf32>,
    } else {
    }
    return
  }
  func.func @transform_0(%arg0: i32, %arg1: i32) -> (i32, i32) {
    %c0_i32 = arith.constant 0 : i32
    %0 = arith.cmpi eq, %arg0, %c0_i32 : i32
    %c0_i32_0 = arith.constant 0 : i32
    %1 = arith.select %0, %c0_i32_0, %arg1 : i32
    %c0_i32_1 = arith.constant 0 : i32
    %c0_i32_2 = arith.constant 0 : i32
    return %1, %c0_i32_1 : i32, i32
  }
  func.func @transform_1(%arg0: i32, %arg1: i32) -> (i32, i32) {
    %c2_i32 = arith.constant 2 : i32
    %0 = arith.cmpi eq, %arg0, %c2_i32 : i32
    %c0_i32 = arith.constant 0 : i32
    %1 = arith.select %0, %c0_i32, %arg1 : i32
    %c0_i32_0 = arith.constant 0 : i32
    %c0_i32_1 = arith.constant 0 : i32
    return %1, %c0_i32_0 : i32, i32
  }
  func.func @transform_2(%arg0: i32, %arg1: i32) -> (i32, i32) {
    %c0_i32 = arith.constant 0 : i32
    %c0_i32_0 = arith.constant 0 : i32
    %c0_i32_1 = arith.constant 0 : i32
    return %c0_i32, %c0_i32_0 : i32, i32
  }
  func.func @transform_3(%arg0: i32, %arg1: i32) -> (i32, i32) {
    %c0_i32 = arith.constant 0 : i32
    %c0_i32_0 = arith.constant 0 : i32
    %c0_i32_1 = arith.constant 0 : i32
    return %c0_i32, %c0_i32_0 : i32, i32
  }
  func.func @transform_4(%arg0: i32, %arg1: i32) -> (i32, i32) {
    %c0_i32 = arith.constant 0 : i32
    %c0_i32_0 = arith.constant 0 : i32
    %c0_i32_1 = arith.constant 0 : i32
    return %c0_i32, %c0_i32_0 : i32, i32
  }
  func.func @transform_5(%arg0: i32, %arg1: i32) -> (i32, i32) {
    %c0_i32 = arith.constant 0 : i32
    %c0_i32_0 = arith.constant 0 : i32
    %c0_i32_1 = arith.constant 0 : i32
    return %c0_i32, %c0_i32_0 : i32, i32
  }
  func.func @transform_6(%arg0: i32, %arg1: i32) -> (i32, i32) {
    %c0_i32 = arith.constant 0 : i32
    %c0_i32_0 = arith.constant 0 : i32
    %c0_i32_1 = arith.constant 0 : i32
    return %c0_i32, %c0_i32_0 : i32, i32
  }
  func.func @transform_7(%arg0: i32, %arg1: i32) -> (i32, i32) {
    %c0_i32 = arith.constant 0 : i32
    %c0_i32_0 = arith.constant 0 : i32
    %c0_i32_1 = arith.constant 0 : i32
    return %c0_i32, %c0_i32_0 : i32, i32
  }
  func.func @transform_8(%arg0: i32, %arg1: i32) -> (i32, i32) {
    %c2_i32 = arith.constant 2 : i32
    %0 = arith.cmpi eq, %arg0, %c2_i32 : i32
    %c0_i32 = arith.constant 0 : i32
    %1 = arith.select %0, %arg1, %c0_i32 : i32
    %c0_i32_0 = arith.constant 0 : i32
    %c0_i32_1 = arith.constant 0 : i32
    return %1, %c0_i32_0 : i32, i32
  }
}

</mosaic_0001>

<bundles_post_ra>
// kernel: tpu_custom_call.1
= control target key start
LH: loop header
LB: loop body
LE: loop exit
PB: predicated region body
PF: predicated region fallthrough
CT: control target
= control target key end

     0   :  { %13 = vsyncpa [#allocation6], 0  ;;  %s3134_s0 = inlined_call_operand.hbm [shape: bf16[128,128], index: 0, kind: input, shape index: {}]   ;;  %s3135_s1 = inlined_call_operand.hbm [shape: bf16[128,128], index: 1, kind: input, shape index: {}]   ;;  %s3136_s2 = inlined_call_operand.hbm [shape: bf16[128,128], index: 2, kind: input, shape index: {}]   ;;  %s3137_s3 = inlined_call_operand.hbm [shape: bf16[128,128], index: 3, kind: input, shape index: {}]   ;;  %s3138_s4 = inlined_call_operand.vmem [shape: f32[1,128], index: 4, kind: input, shape index: {}]   ;;  %s3139_s5 = inlined_call_operand.hbm [shape: bf16[128,128], index: 5, kind: input, shape index: {}]   ;;  %s3140_s6 = inlined_call_operand.hbm [shape: bf16[128,128], index: 6, kind: input, shape index: {}]   ;;  %s3141_s7 = inlined_call_operand.vmem [shape: f32[1,128], index: 7, kind: input, shape index: {}]   ;;  %s3142_s8 = inlined_call_operand.hbm [shape: f32[128,128], index: 8, kind: output, shape index: {}]  }
   0x1   :  { %15 = vsyncpa [#allocation6 + $0x1], 0 }
   0x2   :  { %16 = vsyncpa [#allocation9], 0 }
   0x3   :  { %18 = vsyncpa [#allocation9 + $0x1], 0 }
   0x4   :  { %19 = vsyncpa [#allocation12], 0 }
   0x5   :  { %20 = vsyncpa [#allocation15], 0 }
   0x6   :  { %21 = vsyncpa [#allocation7], 0 }
   0x7   :  { %23 = vsyncpa [#allocation7 + $0x1], 0  ;;  %s2966_s27 = smov 0   ;;  %s2968_s28 = smov 0  }
   0x8   :  { %s2970_s29 = smov 0  }
   0x9 LB: > { %s2982_s30 = sadd.s32 4294967295, %s2908_s29   ;;  %s1881_s9 = sadd.s32 4294967294, %s2908_s29   ;;  %s2908_s29 = sphi %s2970_s29, %s29_s29   ;;  %s2904_s28 = sphi %s2968_s28, %s3146_s28   ;;  %s2900_s27 = sphi %s2966_s27, %s3145_s27  }
   0xa   : > { %s41_s10 = sadd.s32 1, %s2904_s28  ;;  %p1882_p0 = scmp.ge.s32.totalorder %s2908_s29, 1 }
   0xb   : > { %p43_p1 = scmp.ge.s32.totalorder %s41_s10, 3  ;;  %p262_p2 = scmp.lt.s32.totalorder %s2908_s29, 4 }
   0xc   : > { %p2601_p3 = scmp.eq.s32.totalorder %s2982_s30, 0  ;;  %s273_s14 = sshll.u32 %s3136_s2, 4  ;;  %s274_s14 = int_to_ptr.hbm [resolvable:$true] %s273_s14 }
   0xd   : > { %s3148_s10 = smov (%p43_p1, %s41_s10), 0  ;;  %p2991_p4 = pnand %p1882_p0, %p262_p2 }
   0xe   : > { %s2910_s15 = smov [#allocation10]   ;;  %s287_s20 = sshll.u32 %s3137_s3, 4  ;;  %s288_s20 = int_to_ptr.hbm [resolvable:$true] %s287_s20 }
   0xf   : > { %p2577_p5 = pneg %p2991_p4  ;;  %s275_s16 = sshll.u32 %s2910_s15, 4  ;;  %s276_s16 = int_to_ptr.vmem [resolvable:$true] %s275_s16 }
  0x10   : > { %s2911_s21 = smov 64   ;;  %s2912_s22 = smov 4  }
  0x11   : > { %p3002_p6 = pnand %p2601_p3, %p2577_p5  ;;  %s2913_s23 = smov [#allocation11]  }
  0x12   : > { %s289_s24 = sshll.u32 %s2913_s23, 4  ;;  %s304_s12 = sshll.u32 %s3139_s5, 4  ;;  %s290_s24 = int_to_ptr.vmem [resolvable:$true] %s289_s24  ;;  %s305_s12 = int_to_ptr.hbm [resolvable:$true] %s304_s12 }
  0x13   : > { %2580 = dma.hbm_to_vmem [thread:$0]  (!%p3002_p6), %s274_s14, 1024, %s276_s16, [#allocation9], %s2911_s21, %s2911_s21, %s2912_s22  }
  0x14   : > { %2583 = dma.hbm_to_vmem [thread:$0]  (!%p3002_p6), %s288_s20, 1024, %s290_s24, [#allocation12], %s2911_s21, %s2911_s21, %s2912_s22  }
  0x15   : > { %s318_s14 = sshll.u32 %s3140_s6, 4  ;;  %s2914_s16 = smov [#allocation13]   ;;  %s319_s14 = int_to_ptr.hbm [resolvable:$true] %s318_s14 }
  0x16   : > { %s306_s18 = sshll.u32 %s2914_s16, 4  ;;  %s2915_s19 = smov [#allocation14]   ;;  %s307_s18 = int_to_ptr.vmem [resolvable:$true] %s306_s18 }
  0x17   : > { %2586 = dma.hbm_to_vmem [thread:$0]  (!%p3002_p6), %s305_s12, 1024, %s307_s18, [#allocation12], %s2911_s21, %s2911_s21, %s2912_s22  }
  0x18   : > { %s320_s23 = sshll.u32 %s2915_s19, 4  ;;  %p2605_p7 = scmp.lt.s32.totalorder %s2908_s29, 3  ;;  %s321_s23 = int_to_ptr.vmem [resolvable:$true] %s320_s23 }
  0x19   : > { %p2606_p8 = scmp.eq.s32.totalorder %s2908_s29, 0  ;;  %s349_s25 = sshll.u32 %s3134_s0, 4  ;;  %s350_s25 = int_to_ptr.hbm [resolvable:$true] %s349_s25 }
  0x1a   : > { %2589 = dma.hbm_to_vmem [thread:$0]  (!%p3002_p6), %s319_s14, 1024, %s321_s23, [#allocation15], %s2911_s21, %s2911_s21, %s2912_s22  }
  0x1b   : > { %s2916_s26 = smov [#allocation5]   ;;  %p2591_p9 = pnand %p2606_p8, %p2605_p7 }
  0x1c   : > { %s351_s13 = sshll.u32 %s2916_s26, 4  ;;  %s361_s12 = sand.u32 1, %s2908_s29   ;;  %s352_s13 = int_to_ptr.vmem [resolvable:$true] %s351_s13 }
  0x1d   : > { %s373_s18 = sshll.u32 %s3135_s1, 4  ;;  %s2917_s17 = smov [#allocation8]   ;;  %s374_s18 = int_to_ptr.hbm [resolvable:$true] %s373_s18 }
  0x1e   : > { %2593 = dma.hbm_to_vmem [thread:$0]  (!%p2591_p9), %s350_s25, 1024, %s352_s13, [#allocation6], %s2911_s21, %s2911_s21, %s2912_s22  }
  0x1f   : > { %s375_s14 = sshll.u32 %s2917_s17, 4  ;;  %s362_s19 = scalar_lea.sflag [#allocation9], %s361_s12  ;;  %s376_s14 = int_to_ptr.vmem [resolvable:$true] %s375_s14 }
  0x20   : > { %2596 = dma.hbm_to_vmem [thread:$0]  (!%p2591_p9), %s374_s18, 1024, %s376_s14, %s362_s19, %s2911_s21, %s2911_s21, %s2912_s22  }
  0x21   : > { %387 = sbr.rel (%p2991_p4) target bundleno = 894 (0x37e), region = 52 }
  0x26   : > { %2875 = dma.done.wait (%p2601_p3), [#allocation6], 1024  }
  0x27   : > { %2877 = vsyncadd (%p2601_p3), [#allocation6], 4294966272  ;;  %s399_s23 = sand.u32 1, %s2982_s30  }
  0x28   : > { %s400_s20 = scalar_lea.sflag [#allocation9], %s399_s23 }
  0x29   : > { %2879 = dma.done.wait (%p2601_p3), %s400_s20, 1024  }
  0x2a   : > { %2881 = vsyncadd (%p2601_p3), %s400_s20, 4294966272 }
  0x2b   : > { %2883 = dma.done.wait (%p2601_p3), [#allocation9], 1024  }
  0x2c   : > { %2885 = vsyncadd (%p2601_p3), [#allocation9], 4294966272 }
  0x2d   : > { %2887 = dma.done.wait (%p2601_p3), [#allocation12], 2048  }
  0x2e   : > { %2889 = vsyncadd (%p2601_p3), [#allocation12], 4294965248 }
  0x2f   : > { %2891 = dma.done.wait (%p2601_p3), [#allocation15], 1024  }
  0x30   : > { %2893 = vsyncadd (%p2601_p3), [#allocation15], 4294966272  ;;  %p1897_p10 = scmp.ne.s32.totalorder %s2900_s27, 0 }
  0x32   : > { %475 = sbr.rel (%p1897_p10) target bundleno = 248 (0xf8), region = 80 }
  0x37   : > { %v2271_v0 = vld [vmem:[#allocation10 + $0x38] sm:$0xff]  ;;  %v2270_v1 = vld [vmem:[#allocation10 + $0x30] sm:$0xff]  ;;  %v2269_v2 = vld [vmem:[#allocation10 + $0x28] sm:$0xff] }
  0x38   : > { %604 = vmatpush.bf16.msra.mxu0 %v2271_v0  ;;  %2485 = vmatpush.bf16.msra.mxu1 %v2271_v0  ;;  %v2268_v3 = vld [vmem:[#allocation10 + $0x20] sm:$0xff]  ;;  %v2267_v4 = vld [vmem:[#allocation10 + $0x18] sm:$0xff]  ;;  %v2266_v5 = vld [vmem:[#allocation10 + $0x10] sm:$0xff] }
  0x39   : > { %2486 = vmatpush.bf16.msra.mxu2 %v2271_v0  ;;  %2487 = vmatpush.bf16.msra.mxu3 %v2271_v0  ;;  %v2265_v6 = vld [vmem:[#allocation10 + $0x8] sm:$0xff]  ;;  %v2264_v7 = vld [vmem:[#allocation10] sm:$0xff]  ;;  %v2258_v9 = vld [vmem:[#allocation8 + $0x10] sm:$0xff] }
  0x3a   : > { %v2256_v8 = vld [vmem:[#allocation8] sm:$0xff]  ;;  %v2262_v11 = vld [vmem:[#allocation8 + $0x30] sm:$0xff]  ;;  %v2257_v12 = vld [vmem:[#allocation8 + $0x8] sm:$0xff] }
  0x3b   : > { %v2260_v10 = vld [vmem:[#allocation8 + $0x20] sm:$0xff]  ;;  %v2259_v13 = vld [vmem:[#allocation8 + $0x18] sm:$0xff]  ;;  %v2261_v14 = vld [vmem:[#allocation8 + $0x28] sm:$0xff] }
  0x3c   : > { %605 = vmatpush.bf16.msra.mxu0 %v2270_v1  ;;  %2488 = vmatpush.bf16.msra.mxu1 %v2270_v1  ;;  %v2263_v15 = vld [vmem:[#allocation8 + $0x38] sm:$0xff] }
  0x3d   : > { %2489 = vmatpush.bf16.msra.mxu2 %v2270_v1  ;;  %2490 = vmatpush.bf16.msra.mxu3 %v2270_v1 }
  0x40   : > { %606 = vmatpush.bf16.msra.mxu0 %v2269_v2  ;;  %2491 = vmatpush.bf16.msra.mxu1 %v2269_v2 }
  0x41   : > { %2492 = vmatpush.bf16.msra.mxu2 %v2269_v2  ;;  %2493 = vmatpush.bf16.msra.mxu3 %v2269_v2 }
  0x44   : > { %607 = vmatpush.bf16.msra.mxu0 %v2268_v3  ;;  %2494 = vmatpush.bf16.msra.mxu1 %v2268_v3 }
  0x45   : > { %2495 = vmatpush.bf16.msra.mxu2 %v2268_v3  ;;  %2496 = vmatpush.bf16.msra.mxu3 %v2268_v3 }
  0x48   : > { %608 = vmatpush.bf16.msra.mxu0 %v2267_v4  ;;  %2497 = vmatpush.bf16.msra.mxu1 %v2267_v4 }
  0x49   : > { %2498 = vmatpush.bf16.msra.mxu2 %v2267_v4  ;;  %2499 = vmatpush.bf16.msra.mxu3 %v2267_v4 }
  0x4c   : > { %609 = vmatpush.bf16.msra.mxu0 %v2266_v5  ;;  %2500 = vmatpush.bf16.msra.mxu1 %v2266_v5 }
  0x4d   : > { %2501 = vmatpush.bf16.msra.mxu2 %v2266_v5  ;;  %2502 = vmatpush.bf16.msra.mxu3 %v2266_v5 }
  0x50   : > { %610 = vmatpush.bf16.msra.mxu0 %v2265_v6  ;;  %2503 = vmatpush.bf16.msra.mxu1 %v2265_v6 }
  0x51   : > { %2504 = vmatpush.bf16.msra.mxu2 %v2265_v6  ;;  %2505 = vmatpush.bf16.msra.mxu3 %v2265_v6 }
  0x54   : > { %611 = vmatpush.bf16.msra.mxu0 %v2264_v7  ;;  %2506 = vmatpush.bf16.msra.mxu1 %v2264_v7 }
  0x55   : > { %2507 = vmatpush.bf16.msra.mxu2 %v2264_v7  ;;  %2508 = vmatpush.bf16.msra.mxu3 %v2264_v7 }
  0x57   : > { %612 = vmatmul.bf16.vlgmr.msra.gmra.mxu0 %v2256_v8  ;;  %622 = vmatmul.bf16.vlgmr.msra.gmra.mxu1 %v2258_v9 }
  0x58   : > { %632 = vmatmul.bf16.vlgmr.msra.gmra.mxu2 %v2260_v10  ;;  %642 = vmatmul.bf16.vlgmr.msra.gmra.mxu3 %v2262_v11 }
  0x67   : > { %617 = vmatmul.bf16.gmra.mxu0 %v2257_v12  ;;  %627 = vmatmul.bf16.gmra.mxu1 %v2259_v13 }
  0x68   : > { %637 = vmatmul.bf16.gmra.mxu2 %v2261_v14  ;;  %647 = vmatmul.bf16.gmra.mxu3 %v2263_v15 }
  0xd4   : > { %v613_v16 = vpop.f32.mrf.mxu0  ;;  %v623_v17 = vpop.f32.mrf.mxu1 }
  0xdb   : > { %v633_v18 = vpop.f32.mrf.mxu2  ;;  %v643_v19 = vpop.f32.mrf.mxu3 }
  0xdc   : > { %v615_v20 = vpop.f32.mrf.mxu0  ;;  %v625_v21 = vpop.f32.mrf.mxu1 }
  0xdd   : > { %v2347_v22 = vpack.c.bf16 %v615_v20, %v613_v16  ;;  %v2357_v23 = vpack.c.bf16 %v625_v21, %v623_v17 }
  0xdf   : > { %2348 = vst [vmem:[#allocation2 + $0x30] sm:$0xff] %v2347_v22  }
  0xe0   : > { %2465 = vst [vmem:[#allocation2 + $0x18] sm:$0xff] %v2357_v23  }
  0xe3   : > { %v635_v24 = vpop.f32.mrf.mxu2  ;;  %v645_v25 = vpop.f32.mrf.mxu3 }
  0xe4   : > { %v2367_v26 = vpack.c.bf16 %v635_v24, %v633_v18  ;;  %v2377_v27 = vpack.c.bf16 %v645_v25, %v643_v19  ;;  %v618_v28 = vpop.f32.mrf.mxu0  ;;  %v628_v29 = vpop.f32.mrf.mxu1 }
  0xe6   : > { %2467 = vst [vmem:[#allocation2 + $0x8] sm:$0xff] %v2367_v26  }
  0xe7   : > { %2469 = vst [vmem:[#allocation2 + $0x28] sm:$0xff] %v2377_v27  }
  0xeb   : > { %v638_v30 = vpop.f32.mrf.mxu2  ;;  %v648_v31 = vpop.f32.mrf.mxu3 }
  0xec   : > { %v620_v32 = vpop.f32.mrf.mxu0  ;;  %v630_v33 = vpop.f32.mrf.mxu1 }
  0xed   : > { %v2352_v34 = vpack.c.bf16 %v620_v32, %v618_v28  ;;  %v2362_v35 = vpack.c.bf16 %v630_v33, %v628_v29 }
  0xef   : > { %2464 = vst [vmem:[#allocation2] sm:$0xff] %v2352_v34  }
  0xf0   : > { %2466 = vst [vmem:[#allocation2 + $0x10] sm:$0xff] %v2362_v35  }
  0xf3   : > { %v640_v36 = vpop.f32.mrf.mxu2  ;;  %v650_v37 = vpop.f32.mrf.mxu3 }
  0xf4   : > { %v2372_v38 = vpack.c.bf16 %v640_v36, %v638_v30  ;;  %v2382_v39 = vpack.c.bf16 %v650_v37, %v648_v31 }
  0xf6   : > { %2468 = vst [vmem:[#allocation2 + $0x20] sm:$0xff] %v2372_v38  }
  0xf7   : > { %2470 = vst [vmem:[#allocation2 + $0x38] sm:$0xff] %v2382_v39  }
  0xf8 PF: > { %p1962_p11 = scmp.ne.s32.totalorder %s2900_s27, 1 }
  0xfa   : > { %692 = sbr.rel (%p1962_p11) target bundleno = 657 (0x291), region = 84 }
  0xff   : > { %v2303_v40 = vld [vmem:[#allocation11 + $0x38] sm:$0xff]  ;;  %v2302_v42 = vld [vmem:[#allocation11 + $0x30] sm:$0xff]  ;;  %v2286_v43 = vld [vmem:[#allocation2 + $0x28] sm:$0xff] }
 0x100   : > { %v2287_v41 = vld [vmem:[#allocation2 + $0x38] sm:$0xff]  ;;  %853 = vmatpush.bf16.msra.mxu0 %v2303_v40  ;;  %2509 = vmatpush.bf16.msra.mxu3 %v2303_v40  ;;  %v2301_v44 = vld [vmem:[#allocation11 + $0x28] sm:$0xff]  ;;  %v2285_v45 = vld [vmem:[#allocation2 + $0x20] sm:$0xff] }
 0x101   : > { %998 = vmatpush.bf16.msra.mxu1 %v2287_v41  ;;  %v2300_v46 = vld [vmem:[#allocation11 + $0x20] sm:$0xff]  ;;  %v2284_v47 = vld [vmem:[#allocation2 + $0x8] sm:$0xff]  ;;  %v2299_v48 = vld [vmem:[#allocation11 + $0x18] sm:$0xff] }
 0x102   : > { %v2283_v49 = vld [vmem:[#allocation2 + $0x10] sm:$0xff]  ;;  %v2282_v51 = vld [vmem:[#allocation2 + $0x18] sm:$0xff]  ;;  %v2297_v52 = vld [vmem:[#allocation11 + $0x8] sm:$0xff] }
 0x103   : > { %v2298_v50 = vld [vmem:[#allocation11 + $0x10] sm:$0xff]  ;;  %v2281_v53 = vld [vmem:[#allocation2] sm:$0xff]  ;;  %v2289_v59 = vld [vmem:[#allocation8 + $0x8] sm:$0xff] }
 0x104   : > { %854 = vmatpush.bf16.msra.mxu0 %v2302_v42  ;;  %2510 = vmatpush.bf16.msra.mxu3 %v2302_v42  ;;  %v2296_v54 = vld [vmem:[#allocation11] sm:$0xff]  ;;  %v2280_v55 = vld [vmem:[#allocation2 + $0x30] sm:$0xff]  ;;  %v2295_v60 = vld [vmem:[#allocation8 + $0x38] sm:$0xff] }
 0x105   : > { %999 = vmatpush.bf16.msra.mxu1 %v2286_v43  ;;  %v2288_v56 = vld [vmem:[#allocation8] sm:$0xff]  ;;  %v2294_v57 = vld [vmem:[#allocation8 + $0x30] sm:$0xff]  ;;  %v2273_v61 = vld [vmem:[#allocation5 + $0x8] sm:$0xff] }
 0x106   : > { %v2272_v58 = vld [vmem:[#allocation5] sm:$0xff]  ;;  %v2290_v62 = vld [vmem:[#allocation8 + $0x10] sm:$0xff]  ;;  %v2291_v1 = vld [vmem:[#allocation8 + $0x18] sm:$0xff] }
 0x107   : > { %v2278_v63 = vld [vmem:[#allocation5 + $0x30] sm:$0xff]  ;;  %v2279_v2 = vld [vmem:[#allocation5 + $0x38] sm:$0xff]  ;;  %v2309_v6 = vld [vmem:[#allocation13 + $0x28] sm:$0xff] }
 0x108   : > { %855 = vmatpush.bf16.msra.mxu0 %v2301_v44  ;;  %2511 = vmatpush.bf16.msra.mxu3 %v2301_v44  ;;  %v2274_v0 = vld [vmem:[#allocation5 + $0x10] sm:$0xff]  ;;  %v2275_v3 = vld [vmem:[#allocation5 + $0x18] sm:$0xff]  ;;  %v2292_v7 = vld [vmem:[#allocation8 + $0x20] sm:$0xff] }
 0x109   : > { %1000 = vmatpush.bf16.msra.mxu1 %v2285_v45  ;;  %v2311_v4 = vld [vmem:[#allocation13 + $0x38] sm:$0xff]  ;;  %v2310_v5 = vld [vmem:[#allocation13 + $0x30] sm:$0xff]  ;;  %v2276_v8 = vld [vmem:[#allocation5 + $0x20] sm:$0xff] }
 0x10a   : > { %1231 = vmatpush.bf16.msra.mxu2 %v2311_v4  ;;  %v2293_v9 = vld [vmem:[#allocation8 + $0x28] sm:$0xff]  ;;  %v2308_v11 = vld [vmem:[#allocation13 + $0x20] sm:$0xff]  ;;  %v2307_v12 = vld [vmem:[#allocation13 + $0x18] sm:$0xff] }
 0x10b   : > { %v2277_v10 = vld [vmem:[#allocation5 + $0x28] sm:$0xff]  ;;  %v2306_v13 = vld [vmem:[#allocation13 + $0x10] sm:$0xff]  ;;  %v2304_v15 = vld [vmem:[#allocation13] sm:$0xff] }
 0x10c   : > { %856 = vmatpush.bf16.msra.mxu0 %v2300_v46  ;;  %2512 = vmatpush.bf16.msra.mxu3 %v2300_v46  ;;  %v2305_v14 = vld [vmem:[#allocation13 + $0x8] sm:$0xff]  ;;  %v3078_v19 = vld [vmem:[%s3138_s4] ss:$0 sm:$0xff] }
 0x10d   : > { %1001 = vmatpush.bf16.msra.mxu1 %v2284_v47 }
 0x10e   : > { %1232 = vmatpush.bf16.msra.mxu2 %v2310_v5 }
 0x110   : > { %857 = vmatpush.bf16.msra.mxu0 %v2299_v48  ;;  %2513 = vmatpush.bf16.msra.mxu3 %v2299_v48 }
 0x111   : > { %1002 = vmatpush.bf16.msra.mxu1 %v2283_v49 }
 0x112   : > { %1233 = vmatpush.bf16.msra.mxu2 %v2309_v6 }
 0x114   : > { %858 = vmatpush.bf16.msra.mxu0 %v2298_v50  ;;  %2514 = vmatpush.bf16.msra.mxu3 %v2298_v50 }
 0x115   : > { %1003 = vmatpush.bf16.msra.mxu1 %v2282_v51 }
 0x116   : > { %1234 = vmatpush.bf16.msra.mxu2 %v2308_v11 }
 0x118   : > { %859 = vmatpush.bf16.msra.mxu0 %v2297_v52  ;;  %2515 = vmatpush.bf16.msra.mxu3 %v2297_v52 }
 0x119   : > { %1004 = vmatpush.bf16.msra.mxu1 %v2281_v53 }
 0x11a   : > { %1235 = vmatpush.bf16.msra.mxu2 %v2307_v12 }
 0x11c   : > { %860 = vmatpush.bf16.msra.mxu0 %v2296_v54  ;;  %2516 = vmatpush.bf16.msra.mxu3 %v2296_v54 }
 0x11d   : > { %1005 = vmatpush.bf16.msra.mxu1 %v2280_v55 }
 0x11e   : > { %1236 = vmatpush.bf16.msra.mxu2 %v2306_v13 }
 0x11f   : > { %861 = vmatmul.bf16.vlgmr.msra.gmra.mxu0 %v2288_v56  ;;  %891 = vmatmul.bf16.vlgmr.msra.gmra.mxu3 %v2294_v57 }
 0x120   : > { %2517 = vmatpush.bf16.msrb.mxu3 %v2287_v41  ;;  %1006 = vmatmul.bf16.vlgmr.msra.gmra.mxu1 %v2272_v58 }
 0x122   : > { %1237 = vmatpush.bf16.msra.mxu2 %v2305_v14 }
 0x124   : > { %2518 = vmatpush.bf16.msrb.mxu3 %v2286_v43 }
 0x126   : > { %1238 = vmatpush.bf16.msra.mxu2 %v2304_v15 }
 0x128   : > { %2519 = vmatpush.bf16.msrb.mxu3 %v2285_v45 }
 0x12c   : > { %2520 = vmatpush.bf16.msrb.mxu3 %v2284_v47 }
 0x12f   : > { %866 = vmatmul.bf16.gmra.mxu0 %v2289_v59  ;;  %896 = vmatmul.bf16.gmra.mxu3 %v2295_v60 }
 0x130   : > { %2521 = vmatpush.bf16.msrb.mxu3 %v2283_v49  ;;  %1011 = vmatmul.bf16.gmra.mxu1 %v2273_v61 }
 0x134   : > { %2522 = vmatpush.bf16.msrb.mxu3 %v2282_v51 }
 0x138   : > { %2523 = vmatpush.bf16.msrb.mxu3 %v2281_v53 }
 0x13c   : > { %2524 = vmatpush.bf16.msrb.mxu3 %v2280_v55 }
 0x13f   : > { %871 = vmatmul.bf16.gmra.mxu0 %v2290_v62  ;;  %1036 = vmatmul.bf16.vlgmr.msrb.gmra.mxu3 %v2278_v63 }
 0x140   : > { %1016 = vmatmul.bf16.gmra.mxu1 %v2274_v0  ;;  %2525 = vmatpush.bf16.msra.mxu3 %v2311_v4 }
 0x144   : > { %2526 = vmatpush.bf16.msra.mxu3 %v2310_v5 }
 0x148   : > { %2527 = vmatpush.bf16.msra.mxu3 %v2309_v6 }
 0x14c   : > { %2528 = vmatpush.bf16.msra.mxu3 %v2308_v11 }
 0x14f   : > { %876 = vmatmul.bf16.gmra.mxu0 %v2291_v1  ;;  %1041 = vmatmul.bf16.gmra.mxu3 %v2279_v2 }
 0x150   : > { %1021 = vmatmul.bf16.gmra.mxu1 %v2275_v3  ;;  %2529 = vmatpush.bf16.msra.mxu3 %v2307_v12 }
 0x154   : > { %2530 = vmatpush.bf16.msra.mxu3 %v2306_v13 }
 0x158   : > { %2531 = vmatpush.bf16.msra.mxu3 %v2305_v14 }
 0x15c   : > { %2532 = vmatpush.bf16.msra.mxu3 %v2304_v15 }
 0x15f   : > { %881 = vmatmul.bf16.gmra.mxu0 %v2292_v7 }
 0x160   : > { %1026 = vmatmul.bf16.gmra.mxu1 %v2276_v8 }
 0x16f   : > { %886 = vmatmul.bf16.gmra.mxu0 %v2293_v9 }
 0x170   : > { %1031 = vmatmul.bf16.gmra.mxu1 %v2277_v10 }
 0x19c   : > { %v862_v16 = vpop.f32.mrf.mxu0 }
 0x19d   : > { %v1007_v17 = vpop.f32.mrf.mxu1 }
 0x19e   : > { %v1008_v18 = vadd.f32 %v1007_v17, %v862_v16 }
 0x1a0   : > { %v1051_v20 = vadd.f32 %v3078_v19, %v1008_v18 }
 0x1a2   : > { %v892_v21 = vpop.f32.mrf.mxu3  ;;  %v1067_v24 = vmax.f32 %v1051_v20, 0.0 }
 0x1a4   : > { %v864_v22 = vpop.f32.mrf.mxu0  ;;  %v1083_v29 = vpack.c.bf16 %v1067_v24, %v1067_v24 }
 0x1a5   : > { %v1009_v23 = vpop.f32.mrf.mxu1 }
 0x1a6   : > { %v1010_v25 = vadd.f32 %v1009_v23, %v864_v22  ;;  %v1151_v35 = vunpack.c.l.b16 %v1083_v29 }
 0x1a8   : > { %v1052_v26 = vadd.f32 %v3078_v19, %v1010_v25 }
 0x1aa   : > { %v1068_v27 = vmax.f32 %v1052_v26, 0.0  ;;  %v894_v28 = vpop.f32.mrf.mxu3 }
 0x1ac   : > { %v2387_v30 = vpack.c.bf16 %v1068_v27, %v1067_v24  ;;  %v867_v31 = vpop.f32.mrf.mxu0  ;;  %v1084_v32 = vpack.c.bf16 %v1068_v27, %v1068_v27 }
 0x1ad   : > { %v1012_v33 = vpop.f32.mrf.mxu1 }
 0x1ae   : > { %2388 = vst [vmem:[#allocation3] sm:$0xff] %v2387_v30   ;;  %v1013_v34 = vadd.f32 %v1012_v33, %v867_v31  ;;  %v1152_v36 = vunpack.c.l.b16 %v1084_v32 }
 0x1b0   : > { %v1167_v37 = vpack.c.b16 %v1152_v36, %v1151_v35  ;;  %v1053_v38 = vadd.f32 %v3078_v19, %v1013_v34 }
 0x1b2   : > { %1239 = vmatmul.bf16.vlgmr.msra.gmra.mxu2 %v1167_v37  ;;  %v897_v39 = vpop.f32.mrf.mxu3  ;;  %v1069_v42 = vmax.f32 %v1053_v38, 0.0 }
 0x1b4   : > { %v869_v40 = vpop.f32.mrf.mxu0  ;;  %v1085_v47 = vpack.c.bf16 %v1069_v42, %v1069_v42 }
 0x1b5   : > { %v1014_v41 = vpop.f32.mrf.mxu1 }
 0x1b6   : > { %v1015_v43 = vadd.f32 %v1014_v41, %v869_v40  ;;  %v1153_v53 = vunpack.c.l.b16 %v1085_v47 }
 0x1b8   : > { %v1054_v44 = vadd.f32 %v3078_v19, %v1015_v43 }
 0x1ba   : > { %v1070_v45 = vmax.f32 %v1054_v44, 0.0  ;;  %v899_v46 = vpop.f32.mrf.mxu3 }
 0x1bc   : > { %v2392_v48 = vpack.c.bf16 %v1070_v45, %v1069_v42  ;;  %v872_v49 = vpop.f32.mrf.mxu0  ;;  %v1086_v50 = vpack.c.bf16 %v1070_v45, %v1070_v45 }
 0x1bd   : > { %v1017_v51 = vpop.f32.mrf.mxu1 }
 0x1be   : > { %2471 = vst [vmem:[#allocation3 + $0x18] sm:$0xff] %v2392_v48   ;;  %v1018_v52 = vadd.f32 %v1017_v51, %v872_v49  ;;  %v1154_v54 = vunpack.c.l.b16 %v1086_v50 }
 0x1c0   : > { %v1168_v55 = vpack.c.b16 %v1154_v54, %v1153_v53  ;;  %v1055_v56 = vadd.f32 %v3078_v19, %v1018_v52 }
 0x1c2   : > { %1244 = vmatmul.bf16.gmra.mxu2 %v1168_v55  ;;  %v1037_v57 = vpop.f32.mrf.mxu3  ;;  %v1071_v61 = vmax.f32 %v1055_v56, 0.0 }
 0x1c3   : > { %v1038_v58 = vadd.f32 %v1037_v57, %v892_v21 }
 0x1c4   : > { %v874_v59 = vpop.f32.mrf.mxu0  ;;  %v1087_v3 = vpack.c.bf16 %v1071_v61, %v1071_v61 }
 0x1c5   : > { %v1019_v60 = vpop.f32.mrf.mxu1  ;;  %v1063_v63 = vadd.f32 %v3078_v19, %v1038_v58 }
 0x1c6   : > { %v1020_v62 = vadd.f32 %v1019_v60, %v874_v59  ;;  %v1155_v12 = vunpack.c.l.b16 %v1087_v3 }
 0x1c7   : > { %v1079_v4 = vmax.f32 %v1063_v63, 0.0 }
 0x1c8   : > { %v1056_v0 = vadd.f32 %v3078_v19, %v1020_v62 }
 0x1c9   : > { %v1095_v14 = vpack.c.bf16 %v1079_v4, %v1079_v4 }
 0x1ca   : > { %v1072_v1 = vmax.f32 %v1056_v0, 0.0  ;;  %v1039_v2 = vpop.f32.mrf.mxu3 }
 0x1cb   : > { %v1040_v5 = vadd.f32 %v1039_v2, %v894_v28  ;;  %v1163_v22 = vunpack.c.l.b16 %v1095_v14 }
 0x1cc   : > { %v2397_v6 = vpack.c.bf16 %v1072_v1, %v1071_v61  ;;  %v877_v7 = vpop.f32.mrf.mxu0  ;;  %v1088_v8 = vpack.c.bf16 %v1072_v1, %v1072_v1 }
 0x1cd   : > { %v1064_v9 = vadd.f32 %v3078_v19, %v1040_v5  ;;  %v1022_v10 = vpop.f32.mrf.mxu1 }
 0x1ce   : > { %2472 = vst [vmem:[#allocation3 + $0x10] sm:$0xff] %v2397_v6   ;;  %v1023_v11 = vadd.f32 %v1022_v10, %v877_v7  ;;  %v1156_v13 = vunpack.c.l.b16 %v1088_v8 }
 0x1cf   : > { %v1080_v15 = vmax.f32 %v1064_v9, 0.0 }
 0x1d0   : > { %v1169_v16 = vpack.c.b16 %v1156_v13, %v1155_v12  ;;  %v1057_v20 = vadd.f32 %v3078_v19, %v1023_v11 }
 0x1d1   : > { %v1096_v17 = vpack.c.bf16 %v1080_v15, %v1080_v15  ;;  %v2417_v18 = vpack.c.bf16 %v1080_v15, %v1079_v4 }
 0x1d2   : > { %1249 = vmatmul.bf16.gmra.mxu2 %v1169_v16  ;;  %v1042_v21 = vpop.f32.mrf.mxu3  ;;  %v1073_v28 = vmax.f32 %v1057_v20, 0.0 }
 0x1d3   : > { %2476 = vst [vmem:[#allocation3 + $0x30] sm:$0xff] %v2417_v18   ;;  %v1164_v23 = vunpack.c.l.b16 %v1096_v17  ;;  %v1043_v24 = vadd.f32 %v1042_v21, %v897_v39 }
 0x1d4   : > { %v879_v25 = vpop.f32.mrf.mxu0  ;;  %v1089_v34 = vpack.c.bf16 %v1073_v28, %v1073_v28 }
 0x1d5   : > { %v1024_v26 = vpop.f32.mrf.mxu1  ;;  %v1173_v27 = vpack.c.b16 %v1164_v23, %v1163_v22  ;;  %v1065_v30 = vadd.f32 %v3078_v19, %v1043_v24 }
 0x1d6   : > { %v1025_v29 = vadd.f32 %v1024_v26, %v879_v25  ;;  %v1157_v43 = vunpack.c.l.b16 %v1089_v34 }
 0x1d7   : > { %1269 = vmatmul.bf16.vlgmr.msra.gmra.mxu3 %v1173_v27  ;;  %v1081_v35 = vmax.f32 %v1065_v30, 0.0 }
 0x1d8   : > { %v1058_v31 = vadd.f32 %v3078_v19, %v1025_v29 }
 0x1d9   : > { %v1097_v47 = vpack.c.bf16 %v1081_v35, %v1081_v35 }
 0x1da   : > { %v1074_v32 = vmax.f32 %v1058_v31, 0.0  ;;  %v1044_v33 = vpop.f32.mrf.mxu3 }
 0x1db   : > { %v1045_v36 = vadd.f32 %v1044_v33, %v899_v46  ;;  %v1165_v46 = vunpack.c.l.b16 %v1097_v47 }
 0x1dc   : > { %v2402_v37 = vpack.c.bf16 %v1074_v32, %v1073_v28  ;;  %v882_v38 = vpop.f32.mrf.mxu0  ;;  %v1090_v40 = vpack.c.bf16 %v1074_v32, %v1074_v32 }
 0x1dd   : > { %v1066_v39 = vadd.f32 %v3078_v19, %v1045_v36  ;;  %v1027_v41 = vpop.f32.mrf.mxu1 }
 0x1de   : > { %2473 = vst [vmem:[#allocation3 + $0x20] sm:$0xff] %v2402_v37   ;;  %v1028_v42 = vadd.f32 %v1027_v41, %v882_v38  ;;  %v1158_v44 = vunpack.c.l.b16 %v1090_v40 }
 0x1df   : > { %v1082_v45 = vmax.f32 %v1066_v39, 0.0 }
 0x1e0   : > { %v1170_v48 = vpack.c.b16 %v1158_v44, %v1157_v43  ;;  %v1059_v51 = vadd.f32 %v3078_v19, %v1028_v42 }
 0x1e1   : > { %v2422_v49 = vpack.c.bf16 %v1082_v45, %v1081_v35  ;;  %v1098_v50 = vpack.c.bf16 %v1082_v45, %v1082_v45 }
 0x1e2   : > { %1254 = vmatmul.bf16.gmra.mxu2 %v1170_v48  ;;  %v1075_v56 = vmax.f32 %v1059_v51, 0.0 }
 0x1e3   : > { %2477 = vst [vmem:[#allocation3 + $0x38] sm:$0xff] %v2422_v49   ;;  %v1166_v52 = vunpack.c.l.b16 %v1098_v50 }
 0x1e4   : > { %v884_v53 = vpop.f32.mrf.mxu0  ;;  %v1091_v60 = vpack.c.bf16 %v1075_v56, %v1075_v56 }
 0x1e5   : > { %v1029_v54 = vpop.f32.mrf.mxu1  ;;  %v1174_v55 = vpack.c.b16 %v1166_v52, %v1165_v46 }
 0x1e6   : > { %v1030_v57 = vadd.f32 %v1029_v54, %v884_v53  ;;  %v1159_v2 = vunpack.c.l.b16 %v1091_v60 }
 0x1e7   : > { %1274 = vmatmul.bf16.gmra.mxu3 %v1174_v55 }
 0x1e8   : > { %v1060_v58 = vadd.f32 %v3078_v19, %v1030_v57 }
 0x1ea   : > { %v1076_v59 = vmax.f32 %v1060_v58, 0.0 }
 0x1ec   : > { %v2407_v61 = vpack.c.bf16 %v1076_v59, %v1075_v56  ;;  %v887_v62 = vpop.f32.mrf.mxu0  ;;  %v1092_v63 = vpack.c.bf16 %v1076_v59, %v1076_v59 }
 0x1ed   : > { %v1032_v0 = vpop.f32.mrf.mxu1 }
 0x1ee   : > { %2474 = vst [vmem:[#allocation3 + $0x28] sm:$0xff] %v2407_v61   ;;  %v1033_v1 = vadd.f32 %v1032_v0, %v887_v62  ;;  %v1160_v3 = vunpack.c.l.b16 %v1092_v63 }
 0x1f0   : > { %v1171_v4 = vpack.c.b16 %v1160_v3, %v1159_v2  ;;  %v1061_v5 = vadd.f32 %v3078_v19, %v1033_v1 }
 0x1f2   : > { %1259 = vmatmul.bf16.gmra.mxu2 %v1171_v4  ;;  %v1077_v8 = vmax.f32 %v1061_v5, 0.0 }
 0x1f4   : > { %v889_v6 = vpop.f32.mrf.mxu0  ;;  %v1093_v12 = vpack.c.bf16 %v1077_v8, %v1077_v8 }
 0x1f5   : > { %v1034_v7 = vpop.f32.mrf.mxu1 }
 0x1f6   : > { %v1035_v9 = vadd.f32 %v1034_v7, %v889_v6  ;;  %v1161_v15 = vunpack.c.l.b16 %v1093_v12 }
 0x1f8   : > { %v1062_v10 = vadd.f32 %v3078_v19, %v1035_v9 }
 0x1fa   : > { %v1078_v11 = vmax.f32 %v1062_v10, 0.0 }
 0x1fc   : > { %v2412_v13 = vpack.c.bf16 %v1078_v11, %v1077_v8  ;;  %v1094_v14 = vpack.c.bf16 %v1078_v11, %v1078_v11 }
 0x1fe   : > { %2475 = vst [vmem:[#allocation3 + $0x8] sm:$0xff] %v2412_v13   ;;  %v1162_v16 = vunpack.c.l.b16 %v1094_v14 }
 0x200   : > { %v1172_v17 = vpack.c.b16 %v1162_v16, %v1161_v15 }
 0x202   : > { %1264 = vmatmul.bf16.gmra.mxu2 %v1172_v17 }
 0x235   : > { %v1240_v18 = vpop.f32.mrf.mxu2 }
 0x23d   : > { %v1242_v20 = vpop.f32.mrf.mxu2 }
 0x23e   : > { %v2427_v21 = vpack.c.bf16 %v1242_v20, %v1240_v18 }
 0x240   : > { %2428 = vst [vmem:[#allocation4 + $0x28] sm:$0xff] %v2427_v21  }
 0x245   : > { %v1245_v22 = vpop.f32.mrf.mxu2 }
 0x24d   : > { %v1247_v23 = vpop.f32.mrf.mxu2 }
 0x24e   : > { %v2432_v24 = vpack.c.bf16 %v1247_v23, %v1245_v22 }
 0x250   : > { %2478 = vst [vmem:[#allocation4 + $0x20] sm:$0xff] %v2432_v24  }
 0x255   : > { %v1250_v25 = vpop.f32.mrf.mxu2 }
 0x25a   : > { %v1270_v26 = vpop.f32.mrf.mxu3 }
 0x25d   : > { %v1252_v19 = vpop.f32.mrf.mxu2 }
 0x25e   : > { %v2437_v27 = vpack.c.bf16 %v1252_v19, %v1250_v25 }
 0x260   : > { %2479 = vst [vmem:[#allocation4 + $0x38] sm:$0xff] %v2437_v27  }
 0x262   : > { %v1272_v28 = vpop.f32.mrf.mxu3 }
 0x263   : > { %v2457_v29 = vpack.c.bf16 %v1272_v28, %v1270_v26 }
 0x265   : > { %2483 = vst [vmem:[#allocation4 + $0x18] sm:$0xff] %v2457_v29   ;;  %v1255_v30 = vpop.f32.mrf.mxu2 }
 0x26a   : > { %v1275_v31 = vpop.f32.mrf.mxu3 }
 0x26d   : > { %v1257_v32 = vpop.f32.mrf.mxu2 }
 0x26e   : > { %v2442_v33 = vpack.c.bf16 %v1257_v32, %v1255_v30 }
 0x270   : > { %2480 = vst [vmem:[#allocation4 + $0x10] sm:$0xff] %v2442_v33  }
 0x272   : > { %v1277_v34 = vpop.f32.mrf.mxu3 }
 0x273   : > { %v2462_v35 = vpack.c.bf16 %v1277_v34, %v1275_v31 }
 0x275   : > { %2484 = vst [vmem:[#allocation4] sm:$0xff] %v2462_v35   ;;  %v1260_v36 = vpop.f32.mrf.mxu2 }
 0x27d   : > { %v1262_v37 = vpop.f32.mrf.mxu2 }
 0x27e   : > { %v2447_v38 = vpack.c.bf16 %v1262_v37, %v1260_v36 }
 0x280   : > { %2481 = vst [vmem:[#allocation4 + $0x8] sm:$0xff] %v2447_v38  }
 0x285   : > { %v1265_v40 = vpop.f32.mrf.mxu2 }
 0x28d   : > { %v1267_v39 = vpop.f32.mrf.mxu2 }
 0x28e   : > { %v2452_v41 = vpack.c.bf16 %v1267_v39, %v1265_v40 }
 0x290   : > { %2482 = vst [vmem:[#allocation4 + $0x30] sm:$0xff] %v2452_v41  }
 0x291 PF: > { %p2123_p12 = scmp.ne.s32.totalorder %s2900_s27, 2 }
 0x293   : > { %1317 = sbr.rel (%p2123_p12) target bundleno = 890 (0x37a), region = 88 }
 0x298   : > { %v2343_v42 = vld [vmem:[#allocation14 + $0x38] sm:$0xff]  ;;  %v2327_v43 = vld [vmem:[#allocation4] sm:$0xff]  ;;  %v2342_v44 = vld [vmem:[#allocation14 + $0x30] sm:$0xff] }
 0x299   : > { %1482 = vmatpush.bf16.msra.mxu0 %v2343_v42  ;;  %2533 = vmatpush.bf16.msra.mxu2 %v2343_v42  ;;  %v2326_v45 = vld [vmem:[#allocation4 + $0x18] sm:$0xff]  ;;  %v2341_v47 = vld [vmem:[#allocation14 + $0x28] sm:$0xff]  ;;  %v2325_v48 = vld [vmem:[#allocation4 + $0x30] sm:$0xff] }
 0x29a   : > { %1627 = vmatpush.bf16.msra.mxu1 %v2327_v43  ;;  %2541 = vmatpush.bf16.msra.mxu3 %v2327_v43  ;;  %v2340_v49 = vld [vmem:[#allocation14 + $0x20] sm:$0xff]  ;;  %v2324_v50 = vld [vmem:[#allocation4 + $0x8] sm:$0xff]  ;;  %v2339_v51 = vld [vmem:[#allocation14 + $0x18] sm:$0xff] }
 0x29b   : > { %v2323_v46 = vld [vmem:[#allocation4 + $0x10] sm:$0xff]  ;;  %v2322_v53 = vld [vmem:[#allocation4 + $0x38] sm:$0xff]  ;;  %v2337_v54 = vld [vmem:[#allocation14 + $0x8] sm:$0xff] }
 0x29c   : > { %v2338_v52 = vld [vmem:[#allocation14 + $0x10] sm:$0xff]  ;;  %v2321_v55 = vld [vmem:[#allocation4 + $0x20] sm:$0xff]  ;;  %v2320_v57 = vld [vmem:[#allocation4 + $0x28] sm:$0xff] }
 0x29d   : > { %1483 = vmatpush.bf16.msra.mxu0 %v2342_v44  ;;  %2534 = vmatpush.bf16.msra.mxu2 %v2342_v44  ;;  %v2336_v56 = vld [vmem:[#allocation14] sm:$0xff]  ;;  %v2332_v59 = vld [vmem:[#allocation3 + $0x28] sm:$0xff]  ;;  %v2329_v62 = vld [vmem:[#allocation3 + $0x18] sm:$0xff] }
 0x29e   : > { %1628 = vmatpush.bf16.msra.mxu1 %v2326_v45  ;;  %2542 = vmatpush.bf16.msra.mxu3 %v2326_v45  ;;  %v2328_v58 = vld [vmem:[#allocation3] sm:$0xff]  ;;  %v2333_v63 = vld [vmem:[#allocation3 + $0x8] sm:$0xff]  ;;  %v2330_v2 = vld [vmem:[#allocation3 + $0x10] sm:$0xff] }
 0x29f   : > { %v2312_v60 = vld [vmem:[#allocation5] sm:$0xff]  ;;  %v2313_v0 = vld [vmem:[#allocation5 + $0x8] sm:$0xff]  ;;  %v2334_v3 = vld [vmem:[#allocation3 + $0x30] sm:$0xff] }
 0x2a0   : > { %v2316_v61 = vld [vmem:[#allocation5 + $0x20] sm:$0xff]  ;;  %v2317_v1 = vld [vmem:[#allocation5 + $0x28] sm:$0xff]  ;;  %v2314_v4 = vld [vmem:[#allocation5 + $0x10] sm:$0xff] }
 0x2a1   : > { %1484 = vmatpush.bf16.msra.mxu0 %v2341_v47  ;;  %2535 = vmatpush.bf16.msra.mxu2 %v2341_v47  ;;  %v2318_v5 = vld [vmem:[#allocation5 + $0x30] sm:$0xff]  ;;  %v2331_v6 = vld [vmem:[#allocation3 + $0x20] sm:$0xff]  ;;  %v2335_v7 = vld [vmem:[#allocation3 + $0x38] sm:$0xff] }
 0x2a2   : > { %1629 = vmatpush.bf16.msra.mxu1 %v2325_v48  ;;  %2543 = vmatpush.bf16.msra.mxu3 %v2325_v48  ;;  %v2315_v8 = vld [vmem:[#allocation5 + $0x18] sm:$0xff]  ;;  %v3100_v11 = vld [vmem:[%s3141_s7] ss:$0 sm:$0xff] }
 0x2a3   : > { %v2319_v9 = vld [vmem:[#allocation5 + $0x38] sm:$0xff] }
 0x2a5   : > { %1485 = vmatpush.bf16.msra.mxu0 %v2340_v49  ;;  %2536 = vmatpush.bf16.msra.mxu2 %v2340_v49 }
 0x2a6   : > { %1630 = vmatpush.bf16.msra.mxu1 %v2324_v50  ;;  %2544 = vmatpush.bf16.msra.mxu3 %v2324_v50 }
 0x2a9   : > { %1486 = vmatpush.bf16.msra.mxu0 %v2339_v51  ;;  %2537 = vmatpush.bf16.msra.mxu2 %v2339_v51 }
 0x2aa   : > { %1631 = vmatpush.bf16.msra.mxu1 %v2323_v46  ;;  %2545 = vmatpush.bf16.msra.mxu3 %v2323_v46 }
 0x2ad   : > { %1487 = vmatpush.bf16.msra.mxu0 %v2338_v52  ;;  %2538 = vmatpush.bf16.msra.mxu2 %v2338_v52 }
 0x2ae   : > { %1632 = vmatpush.bf16.msra.mxu1 %v2322_v53  ;;  %2546 = vmatpush.bf16.msra.mxu3 %v2322_v53 }
 0x2b1   : > { %1488 = vmatpush.bf16.msra.mxu0 %v2337_v54  ;;  %2539 = vmatpush.bf16.msra.mxu2 %v2337_v54 }
 0x2b2   : > { %1633 = vmatpush.bf16.msra.mxu1 %v2321_v55  ;;  %2547 = vmatpush.bf16.msra.mxu3 %v2321_v55 }
 0x2b5   : > { %1489 = vmatpush.bf16.msra.mxu0 %v2336_v56  ;;  %2540 = vmatpush.bf16.msra.mxu2 %v2336_v56 }
 0x2b6   : > { %1634 = vmatpush.bf16.msra.mxu1 %v2320_v57  ;;  %2548 = vmatpush.bf16.msra.mxu3 %v2320_v57 }
 0x2b8   : > { %1490 = vmatmul.bf16.vlgmr.msra.gmra.mxu0 %v2328_v58  ;;  %1510 = vmatmul.bf16.vlgmr.msra.gmra.mxu2 %v2332_v59 }
 0x2b9   : > { %1635 = vmatmul.bf16.vlgmr.msra.gmra.mxu1 %v2312_v60  ;;  %1655 = vmatmul.bf16.vlgmr.msra.gmra.mxu3 %v2316_v61 }
 0x2c8   : > { %1495 = vmatmul.bf16.gmra.mxu0 %v2329_v62  ;;  %1515 = vmatmul.bf16.gmra.mxu2 %v2333_v63 }
 0x2c9   : > { %1640 = vmatmul.bf16.gmra.mxu1 %v2313_v0  ;;  %1660 = vmatmul.bf16.gmra.mxu3 %v2317_v1 }
 0x2d8   : > { %1500 = vmatmul.bf16.gmra.mxu0 %v2330_v2  ;;  %1520 = vmatmul.bf16.gmra.mxu2 %v2334_v3 }
 0x2d9   : > { %1645 = vmatmul.bf16.gmra.mxu1 %v2314_v4  ;;  %1665 = vmatmul.bf16.gmra.mxu3 %v2318_v5 }
 0x2e8   : > { %1505 = vmatmul.bf16.gmra.mxu0 %v2331_v6  ;;  %1525 = vmatmul.bf16.gmra.mxu2 %v2335_v7 }
 0x2e9   : > { %1650 = vmatmul.bf16.gmra.mxu1 %v2315_v8  ;;  %1670 = vmatmul.bf16.gmra.mxu3 %v2319_v9 }
 0x335   : > { %v1491_v10 = vpop.f32.mrf.mxu0 }
 0x336   : > { %v1636_v12 = vpop.f32.mrf.mxu1 }
 0x337   : > { %v1637_v13 = vadd.f32 %v1636_v12, %v1491_v10 }
 0x339   : > { %v1680_v14 = vadd.f32 %v3100_v11, %v1637_v13 }
 0x33b   : > { %1696 = vst [vmem:[#allocation16] sm:$0xff] %v1680_v14  ;;  %v1511_v15 = vpop.f32.mrf.mxu2 }
 0x33c   : > { %v1656_v16 = vpop.f32.mrf.mxu3 }
 0x33d   : > { %v1657_v17 = vadd.f32 %v1656_v16, %v1511_v15  ;;  %v1493_v18 = vpop.f32.mrf.mxu0 }
 0x33e   : > { %v1638_v20 = vpop.f32.mrf.mxu1 }
 0x33f   : > { %v1688_v21 = vadd.f32 %v3100_v11, %v1657_v17  ;;  %v1639_v22 = vadd.f32 %v1638_v20, %v1493_v18 }
 0x341   : > { %1704 = vst [vmem:[#allocation16 + $0x40] sm:$0xff] %v1688_v21  ;;  %v1681_v23 = vadd.f32 %v3100_v11, %v1639_v22 }
 0x343   : > { %1697 = vst [vmem:[#allocation16 + $0x8] sm:$0xff] %v1681_v23  ;;  %v1513_v24 = vpop.f32.mrf.mxu2 }
 0x344   : > { %v1658_v25 = vpop.f32.mrf.mxu3 }
 0x345   : > { %v1659_v26 = vadd.f32 %v1658_v25, %v1513_v24  ;;  %v1496_v19 = vpop.f32.mrf.mxu0 }
 0x346   : > { %v1641_v27 = vpop.f32.mrf.mxu1 }
 0x347   : > { %v1689_v28 = vadd.f32 %v3100_v11, %v1659_v26  ;;  %v1642_v29 = vadd.f32 %v1641_v27, %v1496_v19 }
 0x349   : > { %1705 = vst [vmem:[#allocation16 + $0x48] sm:$0xff] %v1689_v28  ;;  %v1682_v30 = vadd.f32 %v3100_v11, %v1642_v29 }
 0x34b   : > { %1698 = vst [vmem:[#allocation16 + $0x10] sm:$0xff] %v1682_v30  ;;  %v1516_v31 = vpop.f32.mrf.mxu2 }
 0x34c   : > { %v1661_v32 = vpop.f32.mrf.mxu3 }
 0x34d   : > { %v1662_v33 = vadd.f32 %v1661_v32, %v1516_v31  ;;  %v1498_v34 = vpop.f32.mrf.mxu0 }
 0x34e   : > { %v1643_v35 = vpop.f32.mrf.mxu1 }
 0x34f   : > { %v1690_v36 = vadd.f32 %v3100_v11, %v1662_v33  ;;  %v1644_v37 = vadd.f32 %v1643_v35, %v1498_v34 }
 0x351   : > { %1706 = vst [vmem:[#allocation16 + $0x50] sm:$0xff] %v1690_v36  ;;  %v1683_v38 = vadd.f32 %v3100_v11, %v1644_v37 }
 0x353   : > { %1699 = vst [vmem:[#allocation16 + $0x18] sm:$0xff] %v1683_v38  ;;  %v1518_v40 = vpop.f32.mrf.mxu2 }
 0x354   : > { %v1663_v39 = vpop.f32.mrf.mxu3 }
 0x355   : > { %v1664_v41 = vadd.f32 %v1663_v39, %v1518_v40  ;;  %v1501_v42 = vpop.f32.mrf.mxu0 }
 0x356   : > { %v1646_v43 = vpop.f32.mrf.mxu1 }
 0x357   : > { %v1691_v44 = vadd.f32 %v3100_v11, %v1664_v41  ;;  %v1647_v45 = vadd.f32 %v1646_v43, %v1501_v42 }
 0x359   : > { %1707 = vst [vmem:[#allocation16 + $0x58] sm:$0xff] %v1691_v44  ;;  %v1684_v47 = vadd.f32 %v3100_v11, %v1647_v45 }
 0x35b   : > { %1700 = vst [vmem:[#allocation16 + $0x20] sm:$0xff] %v1684_v47  ;;  %v1521_v48 = vpop.f32.mrf.mxu2 }
 0x35c   : > { %v1666_v49 = vpop.f32.mrf.mxu3 }
 0x35d   : > { %v1667_v50 = vadd.f32 %v1666_v49, %v1521_v48  ;;  %v1503_v51 = vpop.f32.mrf.mxu0 }
 0x35e   : > { %v1648_v46 = vpop.f32.mrf.mxu1 }
 0x35f   : > { %v1692_v52 = vadd.f32 %v3100_v11, %v1667_v50  ;;  %v1649_v53 = vadd.f32 %v1648_v46, %v1503_v51 }
 0x361   : > { %1708 = vst [vmem:[#allocation16 + $0x60] sm:$0xff] %v1692_v52  ;;  %v1685_v54 = vadd.f32 %v3100_v11, %v1649_v53 }
 0x363   : > { %1701 = vst [vmem:[#allocation16 + $0x28] sm:$0xff] %v1685_v54  ;;  %v1523_v55 = vpop.f32.mrf.mxu2 }
 0x364   : > { %v1668_v56 = vpop.f32.mrf.mxu3 }
 0x365   : > { %v1669_v57 = vadd.f32 %v1668_v56, %v1523_v55  ;;  %v1506_v58 = vpop.f32.mrf.mxu0 }
 0x366   : > { %v1651_v59 = vpop.f32.mrf.mxu1 }
 0x367   : > { %v1693_v60 = vadd.f32 %v3100_v11, %v1669_v57  ;;  %v1652_v61 = vadd.f32 %v1651_v59, %v1506_v58 }
 0x369   : > { %1709 = vst [vmem:[#allocation16 + $0x68] sm:$0xff] %v1693_v60  ;;  %v1686_v62 = vadd.f32 %v3100_v11, %v1652_v61 }
 0x36b   : > { %1702 = vst [vmem:[#allocation16 + $0x30] sm:$0xff] %v1686_v62  ;;  %v1526_v63 = vpop.f32.mrf.mxu2 }
 0x36c   : > { %v1671_v0 = vpop.f32.mrf.mxu3 }
 0x36d   : > { %v1672_v1 = vadd.f32 %v1671_v0, %v1526_v63  ;;  %v1508_v2 = vpop.f32.mrf.mxu0 }
 0x36e   : > { %v1653_v3 = vpop.f32.mrf.mxu1 }
 0x36f   : > { %v1694_v4 = vadd.f32 %v3100_v11, %v1672_v1  ;;  %v1654_v5 = vadd.f32 %v1653_v3, %v1508_v2 }
 0x371   : > { %1710 = vst [vmem:[#allocation16 + $0x70] sm:$0xff] %v1694_v4  ;;  %v1687_v6 = vadd.f32 %v3100_v11, %v1654_v5 }
 0x373   : > { %1703 = vst [vmem:[#allocation16 + $0x38] sm:$0xff] %v1687_v6  ;;  %v1528_v7 = vpop.f32.mrf.mxu2 }
 0x374   : > { %v1673_v8 = vpop.f32.mrf.mxu3 }
 0x375   : > { %v1674_v9 = vadd.f32 %v1673_v8, %v1528_v7 }
 0x377   : > { %v1695_v10 = vadd.f32 %v3100_v11, %v1674_v9 }
 0x379   : > { %1711 = vst [vmem:[#allocation16 + $0x78] sm:$0xff] %v1695_v10 }
 0x37a PF: > { %p2614_p13 = scmp.eq.s32.totalorder %s2982_s30, 2  ;;  %s1729_s26 = sshll.u32 %s3142_s8, 4  ;;  %s1730_s26 = int_to_ptr.hbm [resolvable:$true] %s1729_s26 }
 0x37b   : > { %s2918_s13 = smov [#allocation16]   ;;  %s2919_s15 = smov 128  }
 0x37c   : > { %s1727_s12 = sshll.u32 %s2918_s13, 4  ;;  %s2920_s16 = smov 8   ;;  %s1728_s12 = int_to_ptr.vmem [resolvable:$true] %s1727_s12 }
 0x37d   : > { %2574 = dma.vmem_to_hbm [thread:$0]  (%p2614_p13), %s1728_s12, 2048, %s1730_s26, [#allocation7], %s2919_s15, %s2919_s15, %s2920_s16  }
 0x37e PF: > { %p2615_p0 = scmp.ge.s32.totalorder %s2908_s29, 2  ;;  %p2616_p1 = scmp.eq.s32.totalorder %s1881_s9, 2 }
 0x380   : > { %p2598_p2 = pnand %p2616_p1, %p2615_p0 }
 0x382   : > { %p2599_p3 = pneg %p2598_p2 }
 0x384   : > { %2895 = dma.done.wait (%p2599_p3), [#allocation7], 2048  }
 0x385   : > { %2897 = vsyncadd (%p2599_p3), [#allocation7], 4294965248  ;;  %s29_s29 = sadd.s32 1, %s2908_s29   ;;  %s3145_s27 = smov %s2904_s28 }
 0x386   : > { %p26_p4 = scmp.ge.s32.totalorder %s29_s29, 5   ;;  %s3146_s28 = smov %s3148_s10 }
 0x388   :  { %28 = sbr.rel (!%p26_p4) target bundleno = 9 (0x9), region = 142 }
 0x38d   :  { %1751 = vsyncpa [#allocation6], 1 }
 0x38e   :  { %1753 = vsyncpa [#allocation6 + $0x1], 1 }
 0x38f   :  { %1754 = vsyncpa [#allocation9], 1 }
 0x390   :  { %1756 = vsyncpa [#allocation9 + $0x1], 1 }
 0x391   :  { %1757 = vsyncpa [#allocation12], 1 }
 0x392   :  { %1758 = vsyncpa [#allocation15], 1 }
 0x393   :  { %1759 = vsyncpa [#allocation7], 1 }
 0x394   :  { %1761 = vsyncpa [#allocation7 + $0x1], 1 }

</bundles_post_ra>
